<compile_context>
chip_gen: v5e
topology: v5e:2x2
jax: 0.10.0
libtpu: 0.0.40
codegen_flags: <defaults>
</compile_context>

<pallas_src>
import functools

import jax
import jax.numpy as jnp
from jax.experimental import pallas as pl
from jax.experimental.pallas import tpu as pltpu


def _round_up(x, m):
    return ((x + m - 1) // m) * m


def _fused_actor_critic_kernel(x_ref, w_ref, b_ref, q1_ref, q2_ref, *, D, two_h, A):
    """q1, q2 = heads of relu(x @ W1_cat + b1) @ blockdiag(W2a, W2c) + b2."""
    x = x_ref[...]                                      # (tb, D)     compute dtype
    w = w_ref[...]                                      # (D+2H, W)   compute dtype
    b = b_ref[...]                                      # (2, W)      f32

    # Layer 1: one MXU pass for actor+critic, f32 accumulation; elementwise
    # math kept in f32 on every chip (v5e VPU/EUP have no bf16 path).
    h = jnp.dot(x, w[:D, :two_h], preferred_element_type=jnp.float32)
    h = jnp.maximum(h + b[0:1, :two_h], 0.0)            # (tb, 2H) = [h_actor | h_critic]

    # Layer 2: single block-diagonal matmul -> [q1 | q2 | zeros] in one pass.
    out = jnp.dot(h.astype(w.dtype), w[D:, :], preferred_element_type=jnp.float32)
    out = out + b[1:2, :]

    q1_ref[...] = out[:, :A].astype(q1_ref.dtype)       # (tb, A)
    q2_ref[...] = out[:, A:A + 1].astype(q2_ref.dtype)  # (tb, 1)


def fuse_params(params, compute_dtype=jnp.bfloat16):
    """One-time concat/pad of actor+critic weights into 2 fused kernel operands.

    Returns:
      w: (D + 2H, W) compute_dtype; rows [0, D)     = [W1_actor | W1_critic]
                                    rows [D, D+2H)  = blockdiag(W2_actor, W2_critic)
      b: (2, W) float32; row 0 = [b1_actor | b1_critic], row 1 = [b2_a | b2_c | 0]
      where W = max(2H, A + 1) (zero lane padding).
    """
    w1a, b1a, w2a, b2a = params["w1a"], params["b1a"], params["w2a"], params["b2a"]
    w1c, b1c, w2c, b2c = params["w1c"], params["b1c"], params["w2c"], params["b2c"]
    D, H = w1a.shape
    A = w2a.shape[1]
    two_h = 2 * H
    W = max(two_h, A + 1)

    w = jnp.zeros((D + two_h, W), jnp.float32)
    w = w.at[:D, :H].set(w1a)                  # actor layer 1
    w = w.at[:D, H:two_h].set(w1c)             # critic layer 1
    w = w.at[D:D + H, :A].set(w2a)             # actor head
    w = w.at[D + H:, A:A + 1].set(w2c)         # critic head

    b = jnp.zeros((2, W), jnp.float32)
    b = b.at[0, :H].set(b1a[0])
    b = b.at[0, H:two_h].set(b1c[0])
    b = b.at[1, :A].set(b2a[0])
    b = b.at[1, A:A + 1].set(b2c[0])

    return {"w": w.astype(compute_dtype), "b": b}


def _pick_batch_tile(B, block_b, *, min_split=512):
    """Rows per grid step: large tiles amortize the ~0.35us/step overhead, but
    once B >= min_split the tile is capped at ceil(B/2) (rounded to 8) so the
    "parallel" batch axis yields >= 2 programs and both v7x TCs get work."""
    block_b = _round_up(max(block_b, 8), 8)
    if B < min_split:
        return B if B <= block_b else block_b
    tb = min(block_b, _round_up(pl.cdiv(B, 2), 8))
    return B if tb >= B else tb


def wrapper_state2_forward(state, fused, action_dim, *, block_b=2048):
    """Pallas implementation of WrapperState2.forward(state) -> (q1, q2)."""
    B, D = state.shape
    w, b = fused["w"], fused["b"]
    two_h = w.shape[0] - D
    Wp = w.shape[1]
    A = action_dim

    x = state.astype(w.dtype)                 # bf16 memory path by default
    tb = _pick_batch_tile(B, block_b)
    grid = (pl.cdiv(B, tb),)

    kernel = functools.partial(_fused_actor_critic_kernel, D=D, two_h=two_h, A=A)

    flops = 2 * B * (D * two_h + two_h * (A + 1))
    bytes_accessed = (x.size * x.dtype.itemsize
                      + w.size * w.dtype.itemsize
                      + b.size * b.dtype.itemsize
                      + B * (A + 1) * 4)

    q1, q2 = pl.pallas_call(
        kernel,
        out_shape=(jax.ShapeDtypeStruct((B, A), jnp.float32),
                   jax.ShapeDtypeStruct((B, 1), jnp.float32)),
        grid=grid,
        in_specs=[
            pl.BlockSpec((tb, D), lambda i: (i, 0)),           # state rows
            pl.BlockSpec((D + two_h, Wp), lambda i: (0, 0)),   # fused weight slab (resident)
            pl.BlockSpec((2, Wp), lambda i: (0, 0)),           # fused bias slab (f32)
        ],
        out_specs=(
            pl.BlockSpec((tb, A), lambda i: (i, 0)),           # q1
            pl.BlockSpec((tb, 1), lambda i: (i, 0)),           # q2
        ),
        compiler_params=pltpu.CompilerParams(
            dimension_semantics=("parallel",)),                # shard batch over v7x TCs
        cost_estimate=pl.CostEstimate(
            flops=flops, transcendentals=0, bytes_accessed=bytes_accessed),
    )(x, w, b)
    return q1, q2


def init_params(key, state_dim, hidden_dim, action_dim):
    """Deterministic synthetic parameters, stored (in, out) == torch W.T."""
    ks = jax.random.split(key, 8)
    scale = 0.1
    return {
        "w1a": scale * jax.random.normal(ks[0], (state_dim, hidden_dim), jnp.float32),
        "b1a": scale * jax.random.normal(ks[1], (1, hidden_dim), jnp.float32),
        "w2a": scale * jax.random.normal(ks[2], (hidden_dim, action_dim), jnp.float32),
        "b2a": scale * jax.random.normal(ks[3], (1, action_dim), jnp.float32),
        "w1c": scale * jax.random.normal(ks[4], (state_dim, hidden_dim), jnp.float32),
        "b1c": scale * jax.random.normal(ks[5], (1, hidden_dim), jnp.float32),
        "w2c": scale * jax.random.normal(ks[6], (hidden_dim, 1), jnp.float32),
        "b2c": scale * jax.random.normal(ks[7], (1, 1), jnp.float32),
    }


def reference_forward(state, p):
    ha = jnp.maximum(state @ p["w1a"] + p["b1a"], 0.0)
    q1 = ha @ p["w2a"] + p["b2a"]
    hc = jnp.maximum(state @ p["w1c"] + p["b1c"], 0.0)
    q2 = hc @ p["w2c"] + p["b2c"]
    return q1, q2


if __name__ == "__main__":
    key = jax.random.PRNGKey(0)
    k_state, k_params = jax.random.split(key)

    B, D, H, A = 8, 32, 64, 8              # batch, state_dim, hidden, action_dim
    state = jax.random.normal(k_state, (B, D), jnp.float32)
    params = init_params(k_params, D, H, A)
    r1, r2 = reference_forward(state, params)

    # f32 compute path: bit-tight check against the reference.
    fused_f32 = fuse_params(params, compute_dtype=jnp.float32)
    q1, q2 = jax.block_until_ready(wrapper_state2_forward(state, fused_f32, A))
    assert q1.shape == (B, A) and q2.shape == (B, 1)
    assert jnp.allclose(q1, r1, atol=1e-5, rtol=1e-5)
    assert jnp.allclose(q2, r2, atol=1e-5, rtol=1e-5)

    # Default bf16 memory path (f32 accumulation / elementwise): loose tolerance.
    fused_bf16 = fuse_params(params)
    q1b, q2b = jax.block_until_ready(wrapper_state2_forward(state, fused_bf16, A))
    assert jnp.allclose(q1b, r1, atol=5e-2, rtol=5e-2)
    assert jnp.allclose(q2b, r2, atol=5e-2, rtol=5e-2)

    print("KERNEL_OK")
</pallas_src>

<mosaic_0001>
module attributes {stable_mosaic.version = 11 : i64} {
  func.func @_fused_actor_critic_kernel(%arg0: i32, %arg1: memref<8x32xf32, #tpu.memory_space<vmem>>, %arg2: memref<160x128xf32, #tpu.memory_space<vmem>>, %arg3: memref<2x128xf32, #tpu.memory_space<vmem>>, %arg4: memref<8x8xf32, #tpu.memory_space<vmem>>, %arg5: memref<8x1xf32, #tpu.memory_space<vmem>>) attributes {dimension_semantics = [#tpu.dimension_semantics<parallel>], iteration_bounds = array<i64: 1>, scalar_prefetch = 0 : i64, scratch_operands = 0 : i64, tpu.core_type = #tpu.core_type<tc>, window_params = [{transform_indices = @transform_0, window_bounds = array<i64: 8, 32>}, {pipeline_mode = #tpu.pipeline_mode<synchronous>, transform_indices = @transform_1, window_bounds = array<i64: 160, 128>}, {pipeline_mode = #tpu.pipeline_mode<synchronous>, transform_indices = @transform_2, window_bounds = array<i64: 2, 128>}, {transform_indices = @transform_3, window_bounds = array<i64: 8, 8>}, {transform_indices = @transform_4, window_bounds = array<i64: 8, 1>}]} {
    %c0 = arith.constant 0 : index
    %c0_0 = arith.constant 0 : index
    %0 = vector.load %arg1[%c0, %c0_0] : memref<8x32xf32, #tpu.memory_space<vmem>>, vector<8x32xf32>
    %c0_1 = arith.constant 0 : index
    %c0_2 = arith.constant 0 : index
    %1 = vector.load %arg2[%c0_1, %c0_2] : memref<160x128xf32, #tpu.memory_space<vmem>>, vector<160x128xf32>
    %c0_3 = arith.constant 0 : index
    %c0_4 = arith.constant 0 : index
    %2 = vector.load %arg3[%c0_3, %c0_4] : memref<2x128xf32, #tpu.memory_space<vmem>>, vector<2x128xf32>
    %3 = vector.extract_strided_slice %1 {offsets = [0, 0], sizes = [32, 128], strides = [1, 1]} : vector<160x128xf32> to vector<32x128xf32>
    %cst = arith.constant dense<0.000000e+00> : vector<8x128xf32>
    %4 = tpu.matmul %0, %3, %cst {dimension_numbers = #tpu.dot_dimension_numbers<[1], [0], [0], [1], [0, 0, 1, 1], [], []>} : vector<8x32xf32>, vector<32x128xf32>, vector<8x128xf32> -> vector<8x128xf32>
    %5 = vector.extract_strided_slice %2 {offsets = [0, 0], sizes = [1, 128], strides = [1, 1]} : vector<2x128xf32> to vector<1x128xf32>
    %6 = vector.broadcast %5 : vector<1x128xf32> to vector<8x128xf32>
    %7 = arith.addf %4, %6 : vector<8x128xf32>
    %cst_5 = arith.constant 0.000000e+00 : f32
    %8 = vector.broadcast %cst_5 : f32 to vector<8x128xf32>
    %9 = arith.maximumf %7, %8 : vector<8x128xf32>
    %10 = vector.extract_strided_slice %1 {offsets = [32, 0], sizes = [128, 128], strides = [1, 1]} : vector<160x128xf32> to vector<128x128xf32>
    %cst_6 = arith.constant dense<0.000000e+00> : vector<8x128xf32>
    %11 = tpu.matmul %9, %10, %cst_6 {dimension_numbers = #tpu.dot_dimension_numbers<[1], [0], [0], [1], [0, 0, 1, 1], [], []>} : vector<8x128xf32>, vector<128x128xf32>, vector<8x128xf32> -> vector<8x128xf32>
    %12 = vector.extract_strided_slice %2 {offsets = [1, 0], sizes = [1, 128], strides = [1, 1]} : vector<2x128xf32> to vector<1x128xf32>
    %13 = vector.broadcast %12 : vector<1x128xf32> to vector<8x128xf32>
    %14 = arith.addf %11, %13 : vector<8x128xf32>
    %15 = vector.extract_strided_slice %14 {offsets = [0, 0], sizes = [8, 8], strides = [1, 1]} : vector<8x128xf32> to vector<8x8xf32>
    %c0_7 = arith.constant 0 : index
    %c0_8 = arith.constant 0 : index
    %16 = vector.load %arg4[%c0_7, %c0_8] : memref<8x8xf32, #tpu.memory_space<vmem>>, vector<8x8xf32>
    tpu.vector_store %arg4[%c0_7, %c0_8], %15 {strides = array<i32>} : memref<8x8xf32, #tpu.memory_space<vmem>>, vector<8x8xf32>,
    %17 = vector.extract_strided_slice %14 {offsets = [0, 8], sizes = [8, 1], strides = [1, 1]} : vector<8x128xf32> to vector<8x1xf32>
    %c0_9 = arith.constant 0 : index
    %c0_10 = arith.constant 0 : index
    %18 = vector.load %arg5[%c0_9, %c0_10] : memref<8x1xf32, #tpu.memory_space<vmem>>, vector<8x1xf32>
    tpu.vector_store %arg5[%c0_9, %c0_10], %17 {strides = array<i32>} : memref<8x1xf32, #tpu.memory_space<vmem>>, vector<8x1xf32>,
    return
  }
  func.func @transform_0(%arg0: i32) -> (i32, i32) {
    %c0_i32 = arith.constant 0 : i32
    %c0_i32_0 = arith.constant 0 : i32
    return %arg0, %c0_i32 : i32, i32
  }
  func.func @transform_1(%arg0: i32) -> (i32, i32) {
    %c0_i32 = arith.constant 0 : i32
    %c0_i32_0 = arith.constant 0 : i32
    %c0_i32_1 = arith.constant 0 : i32
    return %c0_i32, %c0_i32_0 : i32, i32
  }
  func.func @transform_2(%arg0: i32) -> (i32, i32) {
    %c0_i32 = arith.constant 0 : i32
    %c0_i32_0 = arith.constant 0 : i32
    %c0_i32_1 = arith.constant 0 : i32
    return %c0_i32, %c0_i32_0 : i32, i32
  }
  func.func @transform_3(%arg0: i32) -> (i32, i32) {
    %c0_i32 = arith.constant 0 : i32
    %c0_i32_0 = arith.constant 0 : i32
    return %arg0, %c0_i32 : i32, i32
  }
  func.func @transform_4(%arg0: i32) -> (i32, i32) {
    %c0_i32 = arith.constant 0 : i32
    %c0_i32_0 = arith.constant 0 : i32
    return %arg0, %c0_i32 : i32, i32
  }
}

</mosaic_0001>

<bundles_post_ra>
// kernel: tpu_custom_call.1
= control target key start
LH: loop header
LB: loop body
LE: loop exit
PB: predicated region body
PF: predicated region fallthrough
CT: control target
= control target key end

     0   :  { %10 = vsyncpa [#allocation3], 0  ;;  %s316_s0 = inlined_call_operand.hbm [shape: f32[8,32], index: 0, kind: input, shape index: {}]   ;;  %s317_s1 = inlined_call_operand.hbm [shape: f32[160,128], index: 1, kind: input, shape index: {}]   ;;  %s318_s2 = inlined_call_operand.hbm [shape: f32[2,128], index: 2, kind: input, shape index: {}]   ;;  %s319_s3 = inlined_call_operand.hbm [shape: f32[8,8], index: 3, kind: output, shape index: {0}]   ;;  %s320_s4 = inlined_call_operand.vmem [shape: f32[8,1], index: 4, kind: output, shape index: {1}]  }
   0x1   :  { %11 = vsyncpa [#allocation6], 0  ;;  %s28_s17 = sshll.u32 %s317_s1, 4  ;;  %s29_s17 = int_to_ptr.hbm [resolvable:$true] %s28_s17 }
   0x2   :  { %12 = vsyncpa [#allocation4], 0  ;;  %s269_s18 = smov [#allocation5]   ;;  %s18_s22 = sshll.u32 %s316_s0, 4  ;;  %s19_s22 = int_to_ptr.hbm [resolvable:$true] %s18_s22 }
   0x3   :  { %s30_s19 = sshll.u32 %s269_s18, 4  ;;  %s270_s23 = smov 128   ;;  %s31_s19 = int_to_ptr.vmem [resolvable:$true] %s30_s19 }
   0x4   :  { %s271_s24 = smov 8   ;;  %s272_s25 = smov [#allocation2]  }
   0x5   :  { %36 = dma.hbm_to_vmem [thread:$0]  %s29_s17, 2560, %s31_s19, [#allocation6], %s270_s23, %s270_s23, %s271_s24  }
   0x6   :  { %s20_s26 = sshll.u32 %s272_s25, 4  ;;  %s42_s29 = sshll.u32 %s318_s2, 4  ;;  %s21_s26 = int_to_ptr.vmem [resolvable:$true] %s20_s26  ;;  %s43_s29 = int_to_ptr.hbm [resolvable:$true] %s42_s29 }
   0x7   :  { %23 = dma.hbm_to_vmem [thread:$0]  %s19_s22, 128, %s21_s26, [#allocation3]  }
   0x8   :  { %s273_s1 = smov [#allocation7]  }
   0x9   :  { %s44_s30 = sshll.u32 %s273_s1, 4  ;;  %s45_s30 = int_to_ptr.vmem [resolvable:$true] %s44_s30 }
   0xa   :  { %47 = dma.hbm_to_vmem [thread:$0]  %s43_s29, 32, %s45_s30, [#allocation6]  }
   0xb   :  { %263 = dma.done.wait [#allocation3], 128  }
   0xc   :  { %264 = vsyncadd [#allocation3], 4294967168 }
   0xd   :  { %265 = dma.done.wait [#allocation6], 2592  }
   0xe   :  { %266 = vsyncadd [#allocation6], 4294964704  ;;  %v64_v0 = vld [vmem:[#allocation5 + $0x18] sm:$0xff]  ;;  %v63_v1 = vld [vmem:[#allocation5 + $0x10] sm:$0xff]  ;;  %vm83_vm0 = vcmask 261120   ;;  %s274_s0 = smov [#allocation8]  }
   0xf   :  { %99 = vmatpush.msra.mxu0 %v64_v0  ;;  %v80_v2 = vld [vmem:[#allocation5 + $0x98] sm:$0xff]  ;;  %v62_v3 = vld [vmem:[#allocation5 + $0x8] sm:$0xff]  ;;  %v79_v4 = vld [vmem:[#allocation5 + $0x90] sm:$0xff]  ;;  %s142_s2 = sshll.u32 %s274_s0, 4  ;;  %s144_s7 = sshll.u32 %s319_s3, 4  ;;  %vm129_vm1 = vcmask 64512   ;;  %s143_s2 = int_to_ptr.vmem [resolvable:$true] %s142_s2  ;;  %s145_s7 = int_to_ptr.hbm [resolvable:$true] %s144_s7 }
  0x10   :  { %109 = vmatpush.msra.mxu1 %v80_v2  ;;  %v78_v5 = vld [vmem:[#allocation5 + $0x88] sm:$0xff]  ;;  %v61_v6 = vld [vmem:[#allocation5] sm:$0xff]  ;;  %v60_v7 = vld [vmem:[#allocation2] sm:$0xff]  ;;  %s275_s8 = smov 120   ;;  %vm135_vm2 = vcmask 7168  }
  0x11   :  { %100 = vmatpush.msra.mxu0 %v63_v1  ;;  %v77_v8 = vld [vmem:[#allocation5 + $0x80] sm:$0xff]  ;;  %v76_v9 = vld [vmem:[#allocation5 + $0x78] sm:$0xff]  ;;  %v75_v10 = vld [vmem:[#allocation5 + $0x70] sm:$0xff] }
  0x12   :  { %110 = vmatpush.msra.mxu1 %v79_v4  ;;  %v74_v11 = vld [vmem:[#allocation5 + $0x68] sm:$0xff]  ;;  %v73_v12 = vld [vmem:[#allocation5 + $0x60] sm:$0xff]  ;;  %v72_v13 = vld [vmem:[#allocation5 + $0x58] sm:$0xff] }
  0x13   :  { %101 = vmatpush.msra.mxu0 %v62_v3  ;;  %v71_v14 = vld [vmem:[#allocation5 + $0x50] sm:$0xff]  ;;  %v70_v15 = vld [vmem:[#allocation5 + $0x48] sm:$0xff]  ;;  %v69_v16 = vld [vmem:[#allocation5 + $0x40] sm:$0xff] }
  0x14   :  { %111 = vmatpush.msra.mxu1 %v78_v5  ;;  %v68_v17 = vld [vmem:[#allocation5 + $0x38] sm:$0xff]  ;;  %v67_v18 = vld [vmem:[#allocation5 + $0x30] sm:$0xff]  ;;  %v66_v19 = vld [vmem:[#allocation5 + $0x28] sm:$0xff] }
  0x15   :  { %102 = vmatpush.msra.mxu0 %v61_v6  ;;  %v65_v20 = vld [vmem:[#allocation5 + $0x20] sm:$0xff] }
  0x16   :  { %159 = vmatmul.msk.f32.vlgmr.msra.gmra.mxu0 %vm83_vm0, %v60_v7  ;;  %112 = vmatpush.msra.mxu1 %v77_v8  ;;  %v81_v21 = vld [vmem:[#allocation7] sm:$0x3] }
  0x17   :  { %v82_v22 = vperm.slane %v81_v21, 0  ;;  %v108_v26 = vperm.slane %v81_v21, 1 }
  0x18   :  { %113 = vmatpush.msra.mxu1 %v76_v9 }
  0x1a   :  { %114 = vmatpush.msra.mxu1 %v75_v10 }
  0x1c   :  { %115 = vmatpush.msra.mxu1 %v74_v11 }
  0x1e   :  { %116 = vmatpush.msra.mxu1 %v73_v12 }
  0x20   :  { %117 = vmatpush.msra.mxu1 %v72_v13 }
  0x22   :  { %118 = vmatpush.msra.mxu1 %v71_v14 }
  0x24   :  { %119 = vmatpush.msra.mxu1 %v70_v15 }
  0x26   :  { %120 = vmatpush.msra.mxu1 %v69_v16 }
  0x28   :  { %121 = vmatpush.msra.mxu1 %v68_v17 }
  0x2a   :  { %122 = vmatpush.msra.mxu1 %v67_v18 }
  0x2c   :  { %123 = vmatpush.msra.mxu1 %v66_v19 }
  0x2e   :  { %124 = vmatpush.msra.mxu1 %v65_v20 }
  0x93   :  { %v104_v23 = vpop.f32.mrf.mxu0 }
  0x94   :  { %v105_v24 = vadd.f32 %v104_v23, %v82_v22 }
  0x96   :  { %v107_v25 = vmax.f32 %v105_v24, 0.0 }
  0x98   :  { %125 = vmatmul.f32.vlgmr.msra.gmra.mxu1 %v107_v25 }
 0x115   :  { %v126_v27 = vpop.f32.mrf.mxu1 }
 0x116   :  { %v127_v28 = vadd.f32 %v126_v27, %v108_v26 }
 0x118   :  { %132 = vrot.lane.b32.xlu0 %v127_v28, %s275_s8  ;;  %130 = vst.msk [vmem:[#allocation8] sm:$0xff] %vm129_vm1, %v127_v28 }
 0x119   :  { %147 = dma.vmem_to_hbm [thread:$0]  %s143_s2, 128, %s145_s7, [#allocation4]  }
 0x18a   :  { %v133_v29 = vpop.permute.xlu0 %132 }
 0x18b   :  { %136 = vst.msk [vmem:[%s320_s4] sm:$0xff] %vm135_vm2, %v133_v29 }
 0x18c   :  { %267 = dma.done.wait [#allocation4], 128  }
 0x18d   :  { %268 = vsyncadd [#allocation4], 4294967168 }
 0x18e   :  { %156 = vsyncpa [#allocation3], 1 }
 0x18f   :  { %157 = vsyncpa [#allocation6], 1 }
 0x190   :  { %158 = vsyncpa [#allocation4], 1 }

</bundles_post_ra>
